<compile_context>
chip_gen: v6e
topology: v6e:2x2x1
jax: 0.10.0
libtpu: 0.0.40
codegen_flags: <defaults>
</compile_context>

<pallas_src>
import jax
import jax.numpy as jnp
from jax.experimental import pallas as pl
from jax.experimental.pallas import tpu as pltpu


def rbf_kernel(x_ref, c_ref, csq_ref, nb_ref, o_ref):
    # x_ref:   (tB, Dp)  padded input tile
    # c_ref:   (tN, Dp)  padded centers tile
    # csq_ref: (1,  tN)  precomputed ||c_j||^2
    # nb_ref:  (1,  tN)  precomputed -betas_j
    # o_ref:   (tB, tN)  output tile
    x = x_ref[...]                                           # (tB, Dp)
    xx = jnp.sum(x * x, axis=-1, keepdims=True)              # (tB, 1)  lane reduce

    # Cross term on the MXU: x @ c.T with f32 accumulation (contract last dims,
    # no explicit transpose materialized).
    cross = jax.lax.dot_general(
        x, c_ref[...],
        dimension_numbers=(((1,), (1,)), ((), ())),
        preferred_element_type=jnp.float32,
    )                                                        # (tB, tN)

    d2 = xx + csq_ref[...] - 2.0 * cross                     # (tB, tN)
    d2 = jnp.maximum(d2, 0.0)                                # guard cancellation
    dist = jnp.sqrt(d2)
    o_ref[...] = jnp.exp(nb_ref[...] * dist)                 # exp/sqrt -> EUP


def _round_up(v, m):
    return ((v + m - 1) // m) * m


def rbf_forward(x, centers, betas, *, tile_b=512, tile_n=512):
    """x: (B, D), centers: (N, D), betas: (N,) -> (B, N), all float32."""
    x = x.astype(jnp.float32)
    centers = centers.astype(jnp.float32)
    betas = betas.astype(jnp.float32)

    B, D = x.shape
    N, D2 = centers.shape
    assert D == D2, "feature dims of x and centers must match"

    # Pad for lane density: D, N -> multiples of 128 (lanes), B -> multiple of 8
    # (sublanes).  Tiles never exceed the padded extents.
    Dp = _round_up(D, 128)

    # Keep double-buffered (tB, Dp) + (tN, Dp) + (tB, tN) f32 tiles comfortably
    # under the default scoped-VMEM limit even for wide feature dims.
    budget_elems = 4 * 1024 * 1024            # ~16 MiB of f32 per live tile set
    max_rows = max(128, budget_elems // max(Dp, 1))
    tile_b = min(tile_b, _round_up(max_rows, 8))
    tile_n = min(tile_n, _round_up(max_rows, 128))

    tB = min(tile_b, _round_up(B, 8))
    tN = min(tile_n, _round_up(N, 128))
    Bp = _round_up(B, tB)
    Np = _round_up(N, tN)

    xp = jnp.pad(x, ((0, Bp - B), (0, Dp - D)))              # zero pad: exact
    cp = jnp.pad(centers, ((0, Np - N), (0, Dp - D)))
    c_sq = jnp.sum(cp * cp, axis=-1).reshape(1, Np)          # ||c_j||^2 once
    neg_betas = jnp.pad(-betas, (0, Np - N)).reshape(1, Np)  # -beta_j once

    grid = (Bp // tB, Np // tN)

    out_padded = pl.pallas_call(
        rbf_kernel,
        out_shape=jax.ShapeDtypeStruct((Bp, Np), jnp.float32),
        grid=grid,
        in_specs=[
            pl.BlockSpec((tB, Dp), lambda i, j: (i, 0)),
            pl.BlockSpec((tN, Dp), lambda i, j: (j, 0)),
            pl.BlockSpec((1, tN), lambda i, j: (0, j)),
            pl.BlockSpec((1, tN), lambda i, j: (0, j)),
        ],
        out_specs=pl.BlockSpec((tB, tN), lambda i, j: (i, j)),
        compiler_params=pltpu.CompilerParams(
            dimension_semantics=("parallel", "parallel")),
    )(xp, cp, c_sq, neg_betas)

    return out_padded[:B, :N]


def rbf_reference(x, centers, betas):
    diff = x[:, None, :] - centers[None, :, :]
    dist = jnp.sqrt(jnp.sum(diff * diff, axis=-1))
    return jnp.exp(-betas[None, :] * dist)


if __name__ == "__main__":
    # Small shapes consistent with the module: batch=8, in_features=32,
    # out_features=16.
    B, IN_FEATURES, OUT_FEATURES = 8, 32, 16

    key = jax.random.PRNGKey(0)
    kx, kc = jax.random.split(key)

    # Deterministic "parameters" matching reset_parameters():
    #   centers ~ U(0, 1), betas = 1
    centers = jax.random.uniform(
        kc, (OUT_FEATURES, IN_FEATURES), dtype=jnp.float32, minval=0.0, maxval=1.0
    )
    betas = jnp.ones((OUT_FEATURES,), dtype=jnp.float32)

    x = jax.random.normal(kx, (B, IN_FEATURES), dtype=jnp.float32)

    out = rbf_forward(x, centers, betas)
    out = jax.block_until_ready(out)

    ref = rbf_reference(x, centers, betas)
    assert out.shape == (B, OUT_FEATURES)
    assert jnp.allclose(out, ref, atol=2e-5, rtol=1e-4), (
        float(jnp.max(jnp.abs(out - ref)))
    )

    print("KERNEL_OK")
</pallas_src>

<mosaic_0001>
module attributes {stable_mosaic.version = 11 : i64} {
  func.func @rbf_kernel(%arg0: i32, %arg1: i32, %arg2: memref<8x128xf32, #tpu.memory_space<vmem>>, %arg3: memref<128x128xf32, #tpu.memory_space<vmem>>, %arg4: memref<1x128xf32, #tpu.memory_space<vmem>>, %arg5: memref<1x128xf32, #tpu.memory_space<vmem>>, %arg6: memref<8x128xf32, #tpu.memory_space<vmem>>) attributes {dimension_semantics = [#tpu.dimension_semantics<parallel>, #tpu.dimension_semantics<parallel>], iteration_bounds = array<i64: 1, 1>, scalar_prefetch = 0 : i64, scratch_operands = 0 : i64, tpu.core_type = #tpu.core_type<tc>, window_params = [{transform_indices = @transform_0, window_bounds = array<i64: 8, 128>}, {transform_indices = @transform_1, window_bounds = array<i64: 128, 128>}, {transform_indices = @transform_2, window_bounds = array<i64: 1, 128>}, {transform_indices = @transform_3, window_bounds = array<i64: 1, 128>}, {transform_indices = @transform_4, window_bounds = array<i64: 8, 128>}]} {
    %c0 = arith.constant 0 : index
    %c0_0 = arith.constant 0 : index
    %0 = vector.load %arg2[%c0, %c0_0] : memref<8x128xf32, #tpu.memory_space<vmem>>, vector<8x128xf32>
    %1 = arith.mulf %0, %0 : vector<8x128xf32>
    %cst = arith.constant dense<0.000000e+00> : vector<8xf32>
    %2 = vector.multi_reduction <add>, %1, %cst [1] : vector<8x128xf32> to vector<8xf32>
    %3 = vector.shape_cast %2 : vector<8xf32> to vector<8x1xf32>
    %c0_1 = arith.constant 0 : index
    %c0_2 = arith.constant 0 : index
    %4 = vector.load %arg3[%c0_1, %c0_2] : memref<128x128xf32, #tpu.memory_space<vmem>>, vector<128x128xf32>
    %cst_3 = arith.constant dense<0.000000e+00> : vector<8x128xf32>
    %5 = tpu.matmul %0, %4, %cst_3 {dimension_numbers = #tpu.dot_dimension_numbers<[1], [1], [0], [0], [0, 0, 1, 0], [], []>} : vector<8x128xf32>, vector<128x128xf32>, vector<8x128xf32> -> vector<8x128xf32>
    %c0_4 = arith.constant 0 : index
    %c0_5 = arith.constant 0 : index
    %6 = vector.load %arg4[%c0_4, %c0_5] : memref<1x128xf32, #tpu.memory_space<vmem>>, vector<1x128xf32>
    %7 = vector.broadcast %3 : vector<8x1xf32> to vector<8x128xf32>
    %8 = vector.broadcast %6 : vector<1x128xf32> to vector<8x128xf32>
    %9 = arith.addf %7, %8 : vector<8x128xf32>
    %cst_6 = arith.constant 2.000000e+00 : f32
    %10 = vector.broadcast %cst_6 : f32 to vector<8x128xf32>
    %11 = arith.mulf %10, %5 : vector<8x128xf32>
    %12 = arith.subf %9, %11 : vector<8x128xf32>
    %cst_7 = arith.constant 0.000000e+00 : f32
    %13 = vector.broadcast %cst_7 : f32 to vector<8x128xf32>
    %14 = arith.maximumf %12, %13 : vector<8x128xf32>
    %15 = math.sqrt %14 : vector<8x128xf32>
    %c0_8 = arith.constant 0 : index
    %c0_9 = arith.constant 0 : index
    %16 = vector.load %arg5[%c0_8, %c0_9] : memref<1x128xf32, #tpu.memory_space<vmem>>, vector<1x128xf32>
    %17 = vector.broadcast %16 : vector<1x128xf32> to vector<8x128xf32>
    %18 = arith.mulf %17, %15 : vector<8x128xf32>
    %19 = math.exp %18 : vector<8x128xf32>
    %c0_10 = arith.constant 0 : index
    %c0_11 = arith.constant 0 : index
    %20 = vector.load %arg6[%c0_10, %c0_11] : memref<8x128xf32, #tpu.memory_space<vmem>>, vector<8x128xf32>
    tpu.vector_store %arg6[%c0_10, %c0_11], %19 {strides = array<i32>} : memref<8x128xf32, #tpu.memory_space<vmem>>, vector<8x128xf32>,
    return
  }
  func.func @transform_0(%arg0: i32, %arg1: i32) -> (i32, i32) {
    %c0_i32 = arith.constant 0 : i32
    %c0_i32_0 = arith.constant 0 : i32
    return %arg0, %c0_i32 : i32, i32
  }
  func.func @transform_1(%arg0: i32, %arg1: i32) -> (i32, i32) {
    %c0_i32 = arith.constant 0 : i32
    %c0_i32_0 = arith.constant 0 : i32
    return %arg1, %c0_i32 : i32, i32
  }
  func.func @transform_2(%arg0: i32, %arg1: i32) -> (i32, i32) {
    %c0_i32 = arith.constant 0 : i32
    %c0_i32_0 = arith.constant 0 : i32
    return %c0_i32, %arg1 : i32, i32
  }
  func.func @transform_3(%arg0: i32, %arg1: i32) -> (i32, i32) {
    %c0_i32 = arith.constant 0 : i32
    %c0_i32_0 = arith.constant 0 : i32
    return %c0_i32, %arg1 : i32, i32
  }
  func.func @transform_4(%arg0: i32, %arg1: i32) -> (i32, i32) {
    %c0_i32 = arith.constant 0 : i32
    return %arg0, %arg1 : i32, i32
  }
}

</mosaic_0001>

<bundles_post_ra>
// kernel: tpu_custom_call.1
= control target key start
LH: loop header
LB: loop body
LE: loop exit
PB: predicated region body
PF: predicated region fallthrough
CT: control target
= control target key end

     0   :  { %9 = vsyncpa [#allocation3], 0  ;;  %s357_s0 = inlined_call_operand.hbm [shape: f32[8,128], index: 0, kind: input, shape index: {}]   ;;  %s358_s1 = inlined_call_operand.hbm [shape: f32[128,128], index: 1, kind: input, shape index: {}]   ;;  %s359_s2 = inlined_call_operand.vmem [shape: f32[1,128], index: 2, kind: input, shape index: {}]   ;;  %s360_s3 = inlined_call_operand.vmem [shape: f32[1,128], index: 3, kind: input, shape index: {}]   ;;  %s361_s4 = inlined_call_operand.hbm [shape: f32[8,128], index: 4, kind: output, shape index: {}]  }
   0x1   :  { %10 = vsyncpa [#allocation6], 0 }
   0x2   :  { %11 = vsyncpa [#allocation4], 0  ;;  %s310_s15 = smov [#allocation2]   ;;  %s311_s17 = smov [#allocation5]  }
   0x3   :  { %s18_s16 = sshll.u32 %s310_s15, 4  ;;  %s27_s18 = sshll.u32 %s311_s17, 4  ;;  %s19_s16 = int_to_ptr.vmem [resolvable:$true] %s18_s16  ;;  %s28_s18 = int_to_ptr.vmem [resolvable:$true] %s27_s18 }
   0x4   :  { %s252_s19 = scalar_lea.vmem %s19_s16, 128  ;;  %p257_p1 = scmp.lt.s32.totalorder %s19_s16, %s19_s16 }
   0x5   :  { %p253_p0 = scmp.ne.s32.totalorder %s19_s16, %s252_s19  ;;  %p258_p2 = scmp.lt.s32.totalorder %s252_s19, %s252_s19 }
   0x7   :  { %p259_p3 = por %p258_p2, %p257_p1 }
   0x9   :  { %p260_p4 = pnand %p259_p3, %p253_p0 }
   0xb   :  { %263 = shalt.err (!%p260_p4)
}
   0xc   :  { %21 = dma.hbm_to_vmem [thread:$0]  %s357_s0, 128, %s19_s16, [#allocation3]  }
   0xd   :  { %s272_s22 = scalar_lea.vmem %s28_s18, 2048  ;;  %p277_p6 = scmp.lt.s32.totalorder %s28_s18, %s28_s18 }
   0xe   :  { %p273_p5 = scmp.ne.s32.totalorder %s28_s18, %s272_s22  ;;  %p278_p7 = scmp.lt.s32.totalorder %s272_s22, %s272_s22 }
  0x10   :  { %p279_p8 = por %p278_p7, %p277_p6 }
  0x12   :  { %p280_p9 = pnand %p279_p8, %p273_p5 }
  0x14   :  { %283 = shalt.err (!%p280_p9)
}
  0x15   :  { %s312_s23 = smov 128   ;;  %s313_s24 = smov 8  }
  0x16   :  { %33 = dma.hbm_to_vmem [thread:$0]  %s358_s1, 2048, %s28_s18, [#allocation6], %s312_s23, %s312_s23, %s313_s24  }
  0x17   :  { %304 = dma.done.wait [#allocation3], 128  }
  0x18   :  { %305 = vsyncadd [#allocation3], 4294967168 }
  0x19   :  { %306 = dma.done.wait [#allocation6], 2048  }
  0x1a   :  { %307 = vsyncadd [#allocation6], 4294965248  ;;  %v314_v0 = vmov 0.0   ;;  %vm315_vm0 = vmmov 0   ;;  %v63_v1 = vld [vmem:[#allocation5 + $0x78] sm:$0xff]  ;;  %v62_v2 = vld [vmem:[#allocation5 + $0x70] sm:$0xff] }
  0x1b   :  { %198 = vmatprep.subr.mxu0 %v314_v0  ;;  %230 = vmatprep.mubr.msk.f32.mxu0 %vm315_vm0, %v314_v0  ;;  %v44_v3 = vld [vmem:[#allocation2] sm:$0xff]  ;;  %v61_v4 = vld [vmem:[#allocation5 + $0x68] sm:$0xff]  ;;  %v60_v6 = vld [vmem:[#allocation5 + $0x60] sm:$0xff] }
  0x1c   :  { %199 = vmatpush3.xpose.msra.mxu0 %v63_v1  ;;  %v45_v5 = vmul.f32 %v44_v3, %v44_v3  ;;  %v59_v7 = vld [vmem:[#allocation5 + $0x58] sm:$0xff]  ;;  %v58_v8 = vld [vmem:[#allocation5 + $0x50] sm:$0xff]  ;;  %v57_v9 = vld [vmem:[#allocation5 + $0x48] sm:$0xff] }
  0x1d   :  { %200 = vmatprep.subr.mxu0 %v314_v0  ;;  %v56_v10 = vld [vmem:[#allocation5 + $0x40] sm:$0xff]  ;;  %v55_v11 = vld [vmem:[#allocation5 + $0x38] sm:$0xff]  ;;  %v54_v12 = vld [vmem:[#allocation5 + $0x30] sm:$0xff] }
  0x1e   :  { %46 = vadd.xlane.f32.xlu0 %v45_v5  ;;  %v53_v13 = vld [vmem:[#allocation5 + $0x28] sm:$0xff]  ;;  %v52_v14 = vld [vmem:[#allocation5 + $0x20] sm:$0xff]  ;;  %v51_v15 = vld [vmem:[#allocation5 + $0x18] sm:$0xff] }
  0x1f   :  { %v50_v16 = vld [vmem:[#allocation5 + $0x10] sm:$0xff]  ;;  %v49_v17 = vld [vmem:[#allocation5 + $0x8] sm:$0xff]  ;;  %v48_v18 = vld [vmem:[#allocation5] sm:$0xff] }
  0x20   :  { %201 = vmatpush3.xpose.msra.mxu0 %v62_v2  ;;  %v179_v20 = vld [vmem:[%s359_s2] ss:$0 sm:$0xff]  ;;  %s316_s2 = smov [#allocation7]  }
  0x21   :  { %202 = vmatprep.subr.mxu0 %v314_v0  ;;  %v180_v30 = vld [vmem:[%s360_s3] ss:$0 sm:$0xff]  ;;  %s169_s29 = sshll.u32 %s316_s2, 4  ;;  %s170_s29 = int_to_ptr.vmem [resolvable:$true] %s169_s29 }
  0x22   :  { %s284_s30 = scalar_lea.vmem %s170_s29, 128  ;;  %p289_p11 = scmp.lt.s32.totalorder %s170_s29, %s170_s29 }
  0x23   :  { %p285_p10 = scmp.ne.s32.totalorder %s170_s29, %s284_s30  ;;  %p290_p12 = scmp.lt.s32.totalorder %s284_s30, %s284_s30 }
  0x24   :  { %203 = vmatpush3.xpose.msra.mxu0 %v61_v4 }
  0x25   :  { %204 = vmatprep.subr.mxu0 %v314_v0  ;;  %p291_p13 = por %p290_p12, %p289_p11 }
  0x27   :  { %p292_p0 = pnand %p291_p13, %p285_p10 }
  0x28   :  { %205 = vmatpush3.xpose.msra.mxu0 %v60_v6 }
  0x29   :  { %206 = vmatprep.subr.mxu0 %v314_v0 }
  0x2c   :  { %207 = vmatpush3.xpose.msra.mxu0 %v59_v7 }
  0x2d   :  { %208 = vmatprep.subr.mxu0 %v314_v0 }
  0x30   :  { %209 = vmatpush3.xpose.msra.mxu0 %v58_v8 }
  0x31   :  { %210 = vmatprep.subr.mxu0 %v314_v0 }
  0x34   :  { %211 = vmatpush3.xpose.msra.mxu0 %v57_v9 }
  0x35   :  { %212 = vmatprep.subr.mxu0 %v314_v0 }
  0x38   :  { %213 = vmatpush3.xpose.msra.mxu0 %v56_v10 }
  0x39   :  { %214 = vmatprep.subr.mxu0 %v314_v0 }
  0x3c   :  { %215 = vmatpush3.xpose.msra.mxu0 %v55_v11 }
  0x3d   :  { %216 = vmatprep.subr.mxu0 %v314_v0 }
  0x40   :  { %217 = vmatpush3.xpose.msra.mxu0 %v54_v12 }
  0x41   :  { %218 = vmatprep.subr.mxu0 %v314_v0 }
  0x44   :  { %219 = vmatpush3.xpose.msra.mxu0 %v53_v13 }
  0x45   :  { %220 = vmatprep.subr.mxu0 %v314_v0 }
  0x48   :  { %221 = vmatpush3.xpose.msra.mxu0 %v52_v14 }
  0x49   :  { %222 = vmatprep.subr.mxu0 %v314_v0 }
  0x4c   :  { %223 = vmatpush3.xpose.msra.mxu0 %v51_v15 }
  0x4d   :  { %224 = vmatprep.subr.mxu0 %v314_v0 }
  0x50   :  { %225 = vmatpush3.xpose.msra.mxu0 %v50_v16 }
  0x51   :  { %226 = vmatprep.subr.mxu0 %v314_v0 }
  0x54   :  { %227 = vmatpush3.xpose.msra.mxu0 %v49_v17 }
  0x55   :  { %228 = vmatprep.subr.mxu0 %v314_v0 }
  0x58   :  { %229 = vmatpush3.xpose.msra.mxu0 %v48_v18 }
  0x5b   :  { %231 = vmatmul.mubr.f32.vlgmr.msra.gmra.mxu0 %v44_v3 }
  0xa7   :  { %v47_v19 = vpop.xlane.xlu0 %46 }
  0xa8   :  { %v141_v21 = vadd.f32 %v179_v20, %v47_v19 }
 0x11b   :  { %v130_v22 = vpop.f32.mrf.mxu0 }
 0x11c   :  { %v142_v23 = vmul.f32 2.0, %v130_v22 }
 0x11d   :  { %v232_v24 = vpop.f32.mrf.mxu0 }
 0x11e   :  { %v143_v25 = vsub.f32 %v141_v21, %v142_v23 }
 0x120   :  { %v144_v26 = vmax.f32 %v143_v25, 0.0 }
 0x122   :  { %240 = vrsqrt.f32 %v144_v26  ;;  %vm147_vm1 = vcmp.eq.f32.partialorder %v144_v26, inf  ;;  %v150_v29 = vand.u32 2147483648, %v144_v26  ;;  %vm149_vm2 = vcmp.eq.f32.partialorder %v144_v26, 0.0 }
 0x12f   :  { %v241_v27 = vpop.eup %240 }
 0x130   :  { %v146_v28 = vmul.f32 %v241_v27, %v144_v26 }
 0x132   :  { %v148_v31 = vsel %vm147_vm1, %v144_v26, %v146_v28 }
 0x133   :  { %v151_v32 = vsel %vm149_vm2, %v150_v29, %v148_v31 }
 0x134   :  { %v159_v33 = vmul.f32 %v180_v30, %v151_v32 }
 0x136   :  { %v160_v34 = vmul.f32 1.442695, %v159_v33 }
 0x138   :  { %242 = vpow2.f32 %v160_v34 }
 0x145   :  { %v243_v35 = vpop.eup %242 }
 0x146   :  { %162 = vst [vmem:[#allocation7] sm:$0xff] %v243_v35 }
 0x147   :  { %295 = shalt.err (!%p292_p0)
}
 0x148   :  { %172 = dma.vmem_to_hbm [thread:$0]  %s170_s29, 128, %s361_s4, [#allocation4]  }
 0x149   :  { %308 = dma.done.wait [#allocation4], 128  }
 0x14a   :  { %309 = vsyncadd [#allocation4], 4294967168 }
 0x14b   :  { %176 = vsyncpa [#allocation3], 1 }
 0x14c   :  { %177 = vsyncpa [#allocation6], 1 }
 0x14d   :  { %178 = vsyncpa [#allocation4], 1 }

</bundles_post_ra>
